<compile_context>
chip_gen: v6e
topology: v6e:2x2x1
jax: 0.10.0
libtpu: 0.0.40
codegen_flags: <defaults>
</compile_context>

<pallas_src>
import functools

import jax
import jax.numpy as jnp
from jax.experimental import pallas as pl
from jax.experimental.pallas import tpu as pltpu

LEAKY_SLOPE = 0.2
BN_EPS = 1e-5

_VMEM = pl.BlockSpec(memory_space=pltpu.MemorySpace.VMEM)


# ---------------------------------------------------------------------------
# Fused Pallas kernel: conv1+lrelu, conv2+bn+lrelu, conv3+bn+lrelu, conv4+bn+lrelu
# ---------------------------------------------------------------------------
def _fused_discriminator_kernel(x_ref,
                                w1_ref, b1_ref,
                                w2_ref, g2_ref, be2_ref,
                                w3_ref, g3_ref, be3_ref,
                                w4_ref, g4_ref, be4_ref,
                                o_ref, *, n_batch, h_in):
    def lrelu(y):
        # slope < 1  =>  LeakyReLU == max(y, slope*y)  (single VPU max)
        return jnp.maximum(y, LEAKY_SLOPE * y)

    def conv(a, h, w_ref):
        # a: (n_batch*h, c_in) batch-flattened activations (rows = batch*height,
        #    lanes = channels);  w_ref: (kh*c_in, c_out) packed weights.
        # Builds the kh-shifted im2col patches (lane-axis concat, per batch so
        # no window crosses a batch boundary) and does ONE MXU dot per layer.
        c_in = a.shape[-1]
        kh = w_ref.shape[0] // c_in                      # static Python int
        ho = h - kh + 1
        rows = []
        for b in range(n_batch):                         # cheap static slices only
            base = b * h
            rows.append(jnp.concatenate(
                [a[base + dh: base + dh + ho, :] for dh in range(kh)], axis=-1))
        patches = rows[0] if n_batch == 1 else jnp.concatenate(rows, axis=0)
        y = jnp.dot(patches, w_ref[...], preferred_element_type=jnp.float32)
        return y, ho                                     # (n_batch*ho, c_out)

    def bn_lrelu(z, g_ref, be_ref):
        # Training-mode BatchNorm2d: biased stats over all (N*H_out) rows.
        # Single pass: per-channel sum and sum-of-squares (one axis-0 reduction
        # pair for the whole batch), rsqrt on the EUP, one scale/shift.
        m = z.shape[0]
        s = jnp.sum(z, axis=0, keepdims=True)
        ss = jnp.sum(z * z, axis=0, keepdims=True)
        mean = s * (1.0 / m)
        var = ss * (1.0 / m) - mean * mean
        scale = g_ref[...] * jax.lax.rsqrt(var + BN_EPS)
        shift = be_ref[...] - mean * scale
        return lrelu(z * scale + shift)

    x = x_ref[...]                                       # (N*H, embed)

    # Layer 1: Conv(1 -> f, (3, embed)) + bias + LeakyReLU (no BN). Since
    # C_in == 1, the embed axis plays the role of the contraction channel.
    z1, h1 = conv(x, h_in, w1_ref)
    a1 = lrelu(z1 + b1_ref[...])
    # Layer 2: Conv(f -> 2f, (5, 1)) + BN + LeakyReLU   (conv bias cancels in BN)
    z2, h2 = conv(a1, h1, w2_ref)
    a2 = bn_lrelu(z2, g2_ref, be2_ref)
    # Layer 3: Conv(2f -> 4f, (3, 1)) + BN + LeakyReLU
    z3, h3 = conv(a2, h2, w3_ref)
    a3 = bn_lrelu(z3, g3_ref, be3_ref)
    # Layer 4: Conv(4f -> 8f, (2, 1)) + BN + LeakyReLU   (K = 128 on the MXU)
    z4, _ = conv(a3, h3, w4_ref)
    o_ref[...] = bn_lrelu(z4, g4_ref, be4_ref)           # single lane-dense store


# ---------------------------------------------------------------------------
# Parameter handling
# ---------------------------------------------------------------------------
def init_params(key, channels=1, features=16, embed=12):
    """Deterministic params in the torch layout (Conv2d: (C_out, C_in, kh, kw))."""
    ks = jax.random.split(key, 16)
    f = features

    def conv(kw_key, kb_key, c_out, c_in, kh, kw_):
        fan_in = c_in * kh * kw_
        bound = 1.0 / jnp.sqrt(fan_in)
        w = jax.random.uniform(kw_key, (c_out, c_in, kh, kw_), jnp.float32, -bound, bound)
        b = jax.random.uniform(kb_key, (1, c_out), jnp.float32, -bound, bound)
        return w, b

    def bn(kg, kb, c):
        g = jax.random.uniform(kg, (1, c), jnp.float32, 0.5, 1.5)
        b = jax.random.uniform(kb, (1, c), jnp.float32, -0.5, 0.5)
        return g, b

    p = {}
    p["w1"], p["b1"] = conv(ks[0], ks[1], f, channels, 3, embed)
    p["w2"], p["b2"] = conv(ks[2], ks[3], 2 * f, f, 5, 1)
    p["g2"], p["be2"] = bn(ks[4], ks[5], 2 * f)
    p["w3"], p["b3"] = conv(ks[6], ks[7], 4 * f, 2 * f, 3, 1)
    p["g3"], p["be3"] = bn(ks[8], ks[9], 4 * f)
    p["w4"], p["b4"] = conv(ks[10], ks[11], 8 * f, 4 * f, 2, 1)
    p["g4"], p["be4"] = bn(ks[12], ks[13], 8 * f)
    return p


def _pack_conv_w(w):
    """(C_out, C_in, kh, kw) -> (kh*C_in*kw, C_out).

    Row ordering is (dh major, c_in, kw minor), matching the in-kernel lane
    layout of the im2col patches (lane-axis concat of the kh shifted slices).
    """
    c_out, c_in, kh, kw = w.shape
    return jnp.transpose(w, (2, 1, 3, 0)).reshape(kh * c_in * kw, c_out)


def pack_params(p):
    """Kernel-layout parameter tuple; run ONCE outside the jitted forward.

    Biases b2/b3/b4 are intentionally omitted: training-mode BatchNorm's mean
    subtraction cancels any per-channel constant added by the conv bias.
    """
    return (
        _pack_conv_w(p["w1"]), p["b1"],
        _pack_conv_w(p["w2"]), p["g2"], p["be2"],
        _pack_conv_w(p["w3"]), p["g3"], p["be3"],
        _pack_conv_w(p["w4"]), p["g4"], p["be4"],
    )


# ---------------------------------------------------------------------------
# Forward pass (NCHW in, NCHW out) — matches Discriminator_peptide.forward
# ---------------------------------------------------------------------------
def discriminator_peptide_forward(packed, x):
    n, c, h, e = x.shape
    assert c == 1, "Discriminator_peptide expects a single input channel"
    w1p, b1, w2p, g2, be2, w3p, g3, be3, w4p, g4, be4 = packed

    # Derive total kernel-height shrink and final channel count statically.
    c_in = e
    kh_total = 0
    for wp in (w1p, w2p, w3p, w4p):
        kh_total += wp.shape[0] // c_in
        c_in = wp.shape[1]
    h_out = h - (kh_total - 4)                           # h - 9
    f_out = c_in                                         # 8 * features

    x2d = x.reshape(n * h, e)                            # contiguous: free reshape
    y = pl.pallas_call(
        functools.partial(_fused_discriminator_kernel, n_batch=n, h_in=h),
        out_shape=jax.ShapeDtypeStruct((n * h_out, f_out), jnp.float32),
        in_specs=[_VMEM] * 12,
        out_specs=_VMEM,
    )(x2d, *packed)
    # (N*H_out, C_out) -> NCHW (N, C_out, H_out, 1); single tiny transpose.
    return jnp.transpose(y.reshape(n, h_out, f_out), (0, 2, 1))[..., None]


# ---------------------------------------------------------------------------
# Pure-JAX reference (for correctness check only) — includes ALL conv biases.
# ---------------------------------------------------------------------------
def _reference_forward(params, x):
    def conv(x, w, b):
        y = jax.lax.conv_general_dilated(
            x, w, window_strides=(1, 1), padding="VALID",
            dimension_numbers=("NCHW", "OIHW", "NCHW"),
            precision=jax.lax.Precision.HIGHEST)
        return y + b.reshape(1, -1, 1, 1)

    def bn(y, g, be):
        mean = y.mean(axis=(0, 2, 3), keepdims=True)
        var = ((y - mean) ** 2).mean(axis=(0, 2, 3), keepdims=True)
        xhat = (y - mean) * jax.lax.rsqrt(var + BN_EPS)
        return xhat * g.reshape(1, -1, 1, 1) + be.reshape(1, -1, 1, 1)

    def lrelu(y):
        return jnp.where(y >= 0, y, LEAKY_SLOPE * y)

    y = lrelu(conv(x, params["w1"], params["b1"]))
    y = lrelu(bn(conv(y, params["w2"], params["b2"]), params["g2"], params["be2"]))
    y = lrelu(bn(conv(y, params["w3"], params["b3"]), params["g3"], params["be3"]))
    y = lrelu(bn(conv(y, params["w4"], params["b4"]), params["g4"], params["be4"]))
    return y


if __name__ == "__main__":
    key = jax.random.PRNGKey(0)
    k_param, k_x = jax.random.split(key)

    N, C, H, EMBED = 2, 1, 16, 12          # seq length 16, embedding width 12
    params = init_params(k_param, channels=C, features=16, embed=EMBED)
    packed = pack_params(params)           # layout conversion done once, outside jit
    x = jax.random.normal(k_x, (N, C, H, EMBED), dtype=jnp.float32)

    fwd = jax.jit(discriminator_peptide_forward)
    out = jax.block_until_ready(fwd(packed, x))

    expected_shape = (N, 128, H - 9, 1)    # (2, 128, 7, 1)
    assert out.shape == expected_shape, (out.shape, expected_shape)
    assert bool(jnp.all(jnp.isfinite(out)))

    ref = jax.block_until_ready(_reference_forward(params, x))
    max_err = float(jnp.max(jnp.abs(out - ref)))
    assert max_err < 5e-3, f"mismatch vs reference: max abs err = {max_err}"

    print("KERNEL_OK")
</pallas_src>

<mosaic_0001>
module attributes {stable_mosaic.version = 11 : i64} {
  func.func @_fused_discriminator_kernel(%arg0: memref<32x12xf32, #tpu.memory_space<vmem>>, %arg1: memref<36x16xf32, #tpu.memory_space<vmem>>, %arg2: memref<1x16xf32, #tpu.memory_space<vmem>>, %arg3: memref<80x32xf32, #tpu.memory_space<vmem>>, %arg4: memref<1x32xf32, #tpu.memory_space<vmem>>, %arg5: memref<1x32xf32, #tpu.memory_space<vmem>>, %arg6: memref<96x64xf32, #tpu.memory_space<vmem>>, %arg7: memref<1x64xf32, #tpu.memory_space<vmem>>, %arg8: memref<1x64xf32, #tpu.memory_space<vmem>>, %arg9: memref<128x128xf32, #tpu.memory_space<vmem>>, %arg10: memref<1x128xf32, #tpu.memory_space<vmem>>, %arg11: memref<1x128xf32, #tpu.memory_space<vmem>>, %arg12: memref<14x128xf32, #tpu.memory_space<vmem>>) attributes {dimension_semantics = [], scalar_prefetch = 0 : i64, scratch_operands = 0 : i64, tpu.core_type = #tpu.core_type<tc>} {
    %c0 = arith.constant 0 : index
    %c0_0 = arith.constant 0 : index
    %0 = vector.load %arg0[%c0, %c0_0] : memref<32x12xf32, #tpu.memory_space<vmem>>, vector<32x12xf32>
    %1 = vector.extract_strided_slice %0 {offsets = [0, 0], sizes = [14, 12], strides = [1, 1]} : vector<32x12xf32> to vector<14x12xf32>
    %2 = vector.extract_strided_slice %0 {offsets = [1, 0], sizes = [14, 12], strides = [1, 1]} : vector<32x12xf32> to vector<14x12xf32>
    %3 = vector.extract_strided_slice %0 {offsets = [2, 0], sizes = [14, 12], strides = [1, 1]} : vector<32x12xf32> to vector<14x12xf32>
    %4 = tpu.concatenate %1, %2, %3 in 1 : vector<14x12xf32>, vector<14x12xf32>, vector<14x12xf32> -> vector<14x36xf32>
    %5 = vector.extract_strided_slice %0 {offsets = [16, 0], sizes = [14, 12], strides = [1, 1]} : vector<32x12xf32> to vector<14x12xf32>
    %6 = vector.extract_strided_slice %0 {offsets = [17, 0], sizes = [14, 12], strides = [1, 1]} : vector<32x12xf32> to vector<14x12xf32>
    %7 = vector.extract_strided_slice %0 {offsets = [18, 0], sizes = [14, 12], strides = [1, 1]} : vector<32x12xf32> to vector<14x12xf32>
    %8 = tpu.concatenate %5, %6, %7 in 1 : vector<14x12xf32>, vector<14x12xf32>, vector<14x12xf32> -> vector<14x36xf32>
    %9 = tpu.concatenate %4, %8 in 0 : vector<14x36xf32>, vector<14x36xf32> -> vector<28x36xf32>
    %c0_1 = arith.constant 0 : index
    %c0_2 = arith.constant 0 : index
    %10 = vector.load %arg1[%c0_1, %c0_2] : memref<36x16xf32, #tpu.memory_space<vmem>>, vector<36x16xf32>
    %cst = arith.constant dense<0.000000e+00> : vector<28x16xf32>
    %11 = tpu.matmul %9, %10, %cst {dimension_numbers = #tpu.dot_dimension_numbers<[1], [0], [0], [1], [0, 0, 1, 1], [], []>} : vector<28x36xf32>, vector<36x16xf32>, vector<28x16xf32> -> vector<28x16xf32>
    %c0_3 = arith.constant 0 : index
    %c0_4 = arith.constant 0 : index
    %12 = vector.load %arg2[%c0_3, %c0_4] : memref<1x16xf32, #tpu.memory_space<vmem>>, vector<1x16xf32>
    %13 = vector.broadcast %12 : vector<1x16xf32> to vector<28x16xf32>
    %14 = arith.addf %11, %13 : vector<28x16xf32>
    %cst_5 = arith.constant 2.000000e-01 : f32
    %15 = vector.broadcast %cst_5 : f32 to vector<28x16xf32>
    %16 = arith.mulf %15, %14 : vector<28x16xf32>
    %17 = arith.maximumf %14, %16 : vector<28x16xf32>
    %18 = vector.extract_strided_slice %17 {offsets = [0, 0], sizes = [10, 16], strides = [1, 1]} : vector<28x16xf32> to vector<10x16xf32>
    %19 = vector.extract_strided_slice %17 {offsets = [1, 0], sizes = [10, 16], strides = [1, 1]} : vector<28x16xf32> to vector<10x16xf32>
    %20 = vector.extract_strided_slice %17 {offsets = [2, 0], sizes = [10, 16], strides = [1, 1]} : vector<28x16xf32> to vector<10x16xf32>
    %21 = vector.extract_strided_slice %17 {offsets = [3, 0], sizes = [10, 16], strides = [1, 1]} : vector<28x16xf32> to vector<10x16xf32>
    %22 = vector.extract_strided_slice %17 {offsets = [4, 0], sizes = [10, 16], strides = [1, 1]} : vector<28x16xf32> to vector<10x16xf32>
    %23 = tpu.concatenate %18, %19, %20, %21, %22 in 1 : vector<10x16xf32>, vector<10x16xf32>, vector<10x16xf32>, vector<10x16xf32>, vector<10x16xf32> -> vector<10x80xf32>
    %24 = vector.extract_strided_slice %17 {offsets = [14, 0], sizes = [10, 16], strides = [1, 1]} : vector<28x16xf32> to vector<10x16xf32>
    %25 = vector.extract_strided_slice %17 {offsets = [15, 0], sizes = [10, 16], strides = [1, 1]} : vector<28x16xf32> to vector<10x16xf32>
    %26 = vector.extract_strided_slice %17 {offsets = [16, 0], sizes = [10, 16], strides = [1, 1]} : vector<28x16xf32> to vector<10x16xf32>
    %27 = vector.extract_strided_slice %17 {offsets = [17, 0], sizes = [10, 16], strides = [1, 1]} : vector<28x16xf32> to vector<10x16xf32>
    %28 = vector.extract_strided_slice %17 {offsets = [18, 0], sizes = [10, 16], strides = [1, 1]} : vector<28x16xf32> to vector<10x16xf32>
    %29 = tpu.concatenate %24, %25, %26, %27, %28 in 1 : vector<10x16xf32>, vector<10x16xf32>, vector<10x16xf32>, vector<10x16xf32>, vector<10x16xf32> -> vector<10x80xf32>
    %30 = tpu.concatenate %23, %29 in 0 : vector<10x80xf32>, vector<10x80xf32> -> vector<20x80xf32>
    %c0_6 = arith.constant 0 : index
    %c0_7 = arith.constant 0 : index
    %31 = vector.load %arg3[%c0_6, %c0_7] : memref<80x32xf32, #tpu.memory_space<vmem>>, vector<80x32xf32>
    %cst_8 = arith.constant dense<0.000000e+00> : vector<20x32xf32>
    %32 = tpu.matmul %30, %31, %cst_8 {dimension_numbers = #tpu.dot_dimension_numbers<[1], [0], [0], [1], [0, 0, 1, 1], [], []>} : vector<20x80xf32>, vector<80x32xf32>, vector<20x32xf32> -> vector<20x32xf32>
    %cst_9 = arith.constant dense<0.000000e+00> : vector<32xf32>
    %33 = vector.multi_reduction <add>, %32, %cst_9 [0] : vector<20x32xf32> to vector<32xf32>
    %34 = vector.shape_cast %33 : vector<32xf32> to vector<1x32xf32>
    %35 = arith.mulf %32, %32 : vector<20x32xf32>
    %cst_10 = arith.constant dense<0.000000e+00> : vector<32xf32>
    %36 = vector.multi_reduction <add>, %35, %cst_10 [0] : vector<20x32xf32> to vector<32xf32>
    %37 = vector.shape_cast %36 : vector<32xf32> to vector<1x32xf32>
    %cst_11 = arith.constant 5.000000e-02 : f32
    %38 = vector.broadcast %cst_11 : f32 to vector<1x32xf32>
    %39 = arith.mulf %34, %38 : vector<1x32xf32>
    %cst_12 = arith.constant 5.000000e-02 : f32
    %40 = vector.broadcast %cst_12 : f32 to vector<1x32xf32>
    %41 = arith.mulf %37, %40 : vector<1x32xf32>
    %42 = arith.mulf %39, %39 : vector<1x32xf32>
    %43 = arith.subf %41, %42 : vector<1x32xf32>
    %c0_13 = arith.constant 0 : index
    %c0_14 = arith.constant 0 : index
    %44 = vector.load %arg4[%c0_13, %c0_14] : memref<1x32xf32, #tpu.memory_space<vmem>>, vector<1x32xf32>
    %cst_15 = arith.constant 9.99999974E-6 : f32
    %45 = vector.broadcast %cst_15 : f32 to vector<1x32xf32>
    %46 = arith.addf %43, %45 : vector<1x32xf32>
    %47 = math.rsqrt %46 : vector<1x32xf32>
    %48 = arith.mulf %44, %47 : vector<1x32xf32>
    %c0_16 = arith.constant 0 : index
    %c0_17 = arith.constant 0 : index
    %49 = vector.load %arg5[%c0_16, %c0_17] : memref<1x32xf32, #tpu.memory_space<vmem>>, vector<1x32xf32>
    %50 = arith.mulf %39, %48 : vector<1x32xf32>
    %51 = arith.subf %49, %50 : vector<1x32xf32>
    %52 = vector.broadcast %48 : vector<1x32xf32> to vector<20x32xf32>
    %53 = arith.mulf %32, %52 : vector<20x32xf32>
    %54 = vector.broadcast %51 : vector<1x32xf32> to vector<20x32xf32>
    %55 = arith.addf %53, %54 : vector<20x32xf32>
    %cst_18 = arith.constant 2.000000e-01 : f32
    %56 = vector.broadcast %cst_18 : f32 to vector<20x32xf32>
    %57 = arith.mulf %56, %55 : vector<20x32xf32>
    %58 = arith.maximumf %55, %57 : vector<20x32xf32>
    %59 = vector.extract_strided_slice %58 {offsets = [0, 0], sizes = [8, 32], strides = [1, 1]} : vector<20x32xf32> to vector<8x32xf32>
    %60 = vector.extract_strided_slice %58 {offsets = [1, 0], sizes = [8, 32], strides = [1, 1]} : vector<20x32xf32> to vector<8x32xf32>
    %61 = vector.extract_strided_slice %58 {offsets = [2, 0], sizes = [8, 32], strides = [1, 1]} : vector<20x32xf32> to vector<8x32xf32>
    %62 = tpu.concatenate %59, %60, %61 in 1 : vector<8x32xf32>, vector<8x32xf32>, vector<8x32xf32> -> vector<8x96xf32>
    %63 = vector.extract_strided_slice %58 {offsets = [10, 0], sizes = [8, 32], strides = [1, 1]} : vector<20x32xf32> to vector<8x32xf32>
    %64 = vector.extract_strided_slice %58 {offsets = [11, 0], sizes = [8, 32], strides = [1, 1]} : vector<20x32xf32> to vector<8x32xf32>
    %65 = vector.extract_strided_slice %58 {offsets = [12, 0], sizes = [8, 32], strides = [1, 1]} : vector<20x32xf32> to vector<8x32xf32>
    %66 = tpu.concatenate %63, %64, %65 in 1 : vector<8x32xf32>, vector<8x32xf32>, vector<8x32xf32> -> vector<8x96xf32>
    %67 = tpu.concatenate %62, %66 in 0 : vector<8x96xf32>, vector<8x96xf32> -> vector<16x96xf32>
    %c0_19 = arith.constant 0 : index
    %c0_20 = arith.constant 0 : index
    %68 = vector.load %arg6[%c0_19, %c0_20] : memref<96x64xf32, #tpu.memory_space<vmem>>, vector<96x64xf32>
    %cst_21 = arith.constant dense<0.000000e+00> : vector<16x64xf32>
    %69 = tpu.matmul %67, %68, %cst_21 {dimension_numbers = #tpu.dot_dimension_numbers<[1], [0], [0], [1], [0, 0, 1, 1], [], []>} : vector<16x96xf32>, vector<96x64xf32>, vector<16x64xf32> -> vector<16x64xf32>
    %cst_22 = arith.constant dense<0.000000e+00> : vector<64xf32>
    %70 = vector.multi_reduction <add>, %69, %cst_22 [0] : vector<16x64xf32> to vector<64xf32>
    %71 = vector.shape_cast %70 : vector<64xf32> to vector<1x64xf32>
    %72 = arith.mulf %69, %69 : vector<16x64xf32>
    %cst_23 = arith.constant dense<0.000000e+00> : vector<64xf32>
    %73 = vector.multi_reduction <add>, %72, %cst_23 [0] : vector<16x64xf32> to vector<64xf32>
    %74 = vector.shape_cast %73 : vector<64xf32> to vector<1x64xf32>
    %cst_24 = arith.constant 6.250000e-02 : f32
    %75 = vector.broadcast %cst_24 : f32 to vector<1x64xf32>
    %76 = arith.mulf %71, %75 : vector<1x64xf32>
    %cst_25 = arith.constant 6.250000e-02 : f32
    %77 = vector.broadcast %cst_25 : f32 to vector<1x64xf32>
    %78 = arith.mulf %74, %77 : vector<1x64xf32>
    %79 = arith.mulf %76, %76 : vector<1x64xf32>
    %80 = arith.subf %78, %79 : vector<1x64xf32>
    %c0_26 = arith.constant 0 : index
    %c0_27 = arith.constant 0 : index
    %81 = vector.load %arg7[%c0_26, %c0_27] : memref<1x64xf32, #tpu.memory_space<vmem>>, vector<1x64xf32>
    %cst_28 = arith.constant 9.99999974E-6 : f32
    %82 = vector.broadcast %cst_28 : f32 to vector<1x64xf32>
    %83 = arith.addf %80, %82 : vector<1x64xf32>
    %84 = math.rsqrt %83 : vector<1x64xf32>
    %85 = arith.mulf %81, %84 : vector<1x64xf32>
    %c0_29 = arith.constant 0 : index
    %c0_30 = arith.constant 0 : index
    %86 = vector.load %arg8[%c0_29, %c0_30] : memref<1x64xf32, #tpu.memory_space<vmem>>, vector<1x64xf32>
    %87 = arith.mulf %76, %85 : vector<1x64xf32>
    %88 = arith.subf %86, %87 : vector<1x64xf32>
    %89 = vector.broadcast %85 : vector<1x64xf32> to vector<16x64xf32>
    %90 = arith.mulf %69, %89 : vector<16x64xf32>
    %91 = vector.broadcast %88 : vector<1x64xf32> to vector<16x64xf32>
    %92 = arith.addf %90, %91 : vector<16x64xf32>
    %cst_31 = arith.constant 2.000000e-01 : f32
    %93 = vector.broadcast %cst_31 : f32 to vector<16x64xf32>
    %94 = arith.mulf %93, %92 : vector<16x64xf32>
    %95 = arith.maximumf %92, %94 : vector<16x64xf32>
    %96 = vector.extract_strided_slice %95 {offsets = [0, 0], sizes = [7, 64], strides = [1, 1]} : vector<16x64xf32> to vector<7x64xf32>
    %97 = vector.extract_strided_slice %95 {offsets = [1, 0], sizes = [7, 64], strides = [1, 1]} : vector<16x64xf32> to vector<7x64xf32>
    %98 = tpu.concatenate %96, %97 in 1 : vector<7x64xf32>, vector<7x64xf32> -> vector<7x128xf32>
    %99 = vector.extract_strided_slice %95 {offsets = [8, 0], sizes = [7, 64], strides = [1, 1]} : vector<16x64xf32> to vector<7x64xf32>
    %100 = vector.extract_strided_slice %95 {offsets = [9, 0], sizes = [7, 64], strides = [1, 1]} : vector<16x64xf32> to vector<7x64xf32>
    %101 = tpu.concatenate %99, %100 in 1 : vector<7x64xf32>, vector<7x64xf32> -> vector<7x128xf32>
    %102 = tpu.concatenate %98, %101 in 0 : vector<7x128xf32>, vector<7x128xf32> -> vector<14x128xf32>
    %c0_32 = arith.constant 0 : index
    %c0_33 = arith.constant 0 : index
    %103 = vector.load %arg9[%c0_32, %c0_33] : memref<128x128xf32, #tpu.memory_space<vmem>>, vector<128x128xf32>
    %cst_34 = arith.constant dense<0.000000e+00> : vector<14x128xf32>
    %104 = tpu.matmul %102, %103, %cst_34 {dimension_numbers = #tpu.dot_dimension_numbers<[1], [0], [0], [1], [0, 0, 1, 1], [], []>} : vector<14x128xf32>, vector<128x128xf32>, vector<14x128xf32> -> vector<14x128xf32>
    %cst_35 = arith.constant dense<0.000000e+00> : vector<128xf32>
    %105 = vector.multi_reduction <add>, %104, %cst_35 [0] : vector<14x128xf32> to vector<128xf32>
    %106 = vector.shape_cast %105 : vector<128xf32> to vector<1x128xf32>
    %107 = arith.mulf %104, %104 : vector<14x128xf32>
    %cst_36 = arith.constant dense<0.000000e+00> : vector<128xf32>
    %108 = vector.multi_reduction <add>, %107, %cst_36 [0] : vector<14x128xf32> to vector<128xf32>
    %109 = vector.shape_cast %108 : vector<128xf32> to vector<1x128xf32>
    %cst_37 = arith.constant 0.0714285746 : f32
    %110 = vector.broadcast %cst_37 : f32 to vector<1x128xf32>
    %111 = arith.mulf %106, %110 : vector<1x128xf32>
    %cst_38 = arith.constant 0.0714285746 : f32
    %112 = vector.broadcast %cst_38 : f32 to vector<1x128xf32>
    %113 = arith.mulf %109, %112 : vector<1x128xf32>
    %114 = arith.mulf %111, %111 : vector<1x128xf32>
    %115 = arith.subf %113, %114 : vector<1x128xf32>
    %c0_39 = arith.constant 0 : index
    %c0_40 = arith.constant 0 : index
    %116 = vector.load %arg10[%c0_39, %c0_40] : memref<1x128xf32, #tpu.memory_space<vmem>>, vector<1x128xf32>
    %cst_41 = arith.constant 9.99999974E-6 : f32
    %117 = vector.broadcast %cst_41 : f32 to vector<1x128xf32>
    %118 = arith.addf %115, %117 : vector<1x128xf32>
    %119 = math.rsqrt %118 : vector<1x128xf32>
    %120 = arith.mulf %116, %119 : vector<1x128xf32>
    %c0_42 = arith.constant 0 : index
    %c0_43 = arith.constant 0 : index
    %121 = vector.load %arg11[%c0_42, %c0_43] : memref<1x128xf32, #tpu.memory_space<vmem>>, vector<1x128xf32>
    %122 = arith.mulf %111, %120 : vector<1x128xf32>
    %123 = arith.subf %121, %122 : vector<1x128xf32>
    %124 = vector.broadcast %120 : vector<1x128xf32> to vector<14x128xf32>
    %125 = arith.mulf %104, %124 : vector<14x128xf32>
    %126 = vector.broadcast %123 : vector<1x128xf32> to vector<14x128xf32>
    %127 = arith.addf %125, %126 : vector<14x128xf32>
    %cst_44 = arith.constant 2.000000e-01 : f32
    %128 = vector.broadcast %cst_44 : f32 to vector<14x128xf32>
    %129 = arith.mulf %128, %127 : vector<14x128xf32>
    %130 = arith.maximumf %127, %129 : vector<14x128xf32>
    %c0_45 = arith.constant 0 : index
    %c0_46 = arith.constant 0 : index
    %131 = vector.load %arg12[%c0_45, %c0_46] : memref<14x128xf32, #tpu.memory_space<vmem>>, vector<14x128xf32>
    tpu.vector_store %arg12[%c0_45, %c0_46], %130 {strides = array<i32>} : memref<14x128xf32, #tpu.memory_space<vmem>>, vector<14x128xf32>,
    return
  }
}

</mosaic_0001>

<bundles_post_ra>
// kernel: discriminator_peptide_forward.1
= control target key start
LH: loop header
LB: loop body
LE: loop exit
PB: predicated region body
PF: predicated region fallthrough
CT: control target
= control target key end

     0   :  { %vm47_vm0 = vcmask 1046528   ;;  %vm127_vm1 = vcmask 1043456   ;;  %vm57_vm2 = vcmask 1045504   ;;  %s1024_s15 = smov 12   ;;  %s1025_s19 = smov 24   ;;  %vm67_vm3 = vcmask 97280   ;;  %s1402_s0 = inlined_call_operand.vmem [shape: f32[32,12], index: 0, kind: input, shape index: {}]   ;;  %s1403_s1 = inlined_call_operand.vmem [shape: f32[36,16], index: 1, kind: input, shape index: {}]   ;;  %s1404_s3 = inlined_call_operand.vmem [shape: f32[80,32], index: 3, kind: input, shape index: {}]   ;;  %s1405_s2 = inlined_call_operand.vmem [shape: f32[1,16], index: 2, kind: input, shape index: {}]   ;;  %s1406_s6 = inlined_call_operand.vmem [shape: f32[96,64], index: 6, kind: input, shape index: {}]   ;;  %s1407_s4 = inlined_call_operand.vmem [shape: f32[1,32], index: 4, kind: input, shape index: {}]   ;;  %s1408_s5 = inlined_call_operand.vmem [shape: f32[1,32], index: 5, kind: input, shape index: {}]   ;;  %s1409_s9 = inlined_call_operand.vmem [shape: f32[128,128], index: 9, kind: input, shape index: {}]   ;;  %s1410_s7 = inlined_call_operand.vmem [shape: f32[1,64], index: 7, kind: input, shape index: {}]   ;;  %s1411_s8 = inlined_call_operand.vmem [shape: f32[1,64], index: 8, kind: input, shape index: {}]   ;;  %s1412_s10 = inlined_call_operand.vmem [shape: f32[1,128], index: 10, kind: input, shape index: {}]   ;;  %s1413_s11 = inlined_call_operand.vmem [shape: f32[1,128], index: 11, kind: input, shape index: {}]   ;;  %s1414_s12 = inlined_call_operand.vmem [shape: f32[14,128], index: 12, kind: output, shape index: {}]  }
   0x1   :  { %v42_v0 = vld [vmem:[%s1402_s0 + $0x8] sm:$0xff]  ;;  %v43_v1 = vld [vmem:[%s1402_s0 + $0x10] sm:$0xff]  ;;  %v1106_v2 = vld [vmem:[%s1402_s0 + $0x18] sm:$0xff]  ;;  %vm70_vm4 = vcmask 195584   ;;  %vm116_vm5 = vcmask 293888   ;;  %v1026_v41 = vmov 0.0  }
   0x2   :  { %v49_v3 = vrot.slane %v42_v0, 1  ;;  %v75_v4 = vrot.slane %v43_v1, 1  ;;  %v76_v5 = vrot.slane %v1106_v2, 1  ;;  %v41_v6 = vld [vmem:[%s1402_s0] sm:$0xff]  ;;  %v84_v7 = vrot.slane %v43_v1, 2  ;;  %v107_v11 = vld [vmem:[%s1403_s1 + $0x18] sm:$0xff]  ;;  %919 = vmatprep.subr.mxu1 %v1026_v41 }
   0x3   :  { %v48_v8 = vrot.slane %v41_v6, 1  ;;  %v85_v9 = vrot.slane %v1106_v2, 2  ;;  %v108_v10 = vld [vmem:[%s1403_s1 + $0x20] sm:$0xf]  ;;  %v106_v14 = vld [vmem:[%s1403_s1 + $0x10] sm:$0xff]  ;;  %v59_v16 = vrot.slane %v42_v0, 2 }
   0x4   :  { %53 = vrot.lane.b32.xlu1 %v49_v3, %s1024_s15  ;;  %v77_v12 = vsel %vm47_vm0, %v75_v4, %v76_v5  ;;  %903 = vmatprep.subr.msk.mxu0 %vm127_vm1, %v108_v10  ;;  %v58_v17 = vrot.slane %v41_v6, 2  ;;  %v105_v18 = vld [vmem:[%s1403_s1 + $0x8] sm:$0xff]  ;;  %v104_v19 = vld [vmem:[%s1403_s1] sm:$0xff]  ;;  %v337_v44 = vld [vmem:[%s1404_s3 + $0x38] sm:$0xff]  ;;  %s1027_s22 = smov 16   ;;  %vm1028_vm6 = vmmov 0  }
   0x5   :  { %78 = vrot.lane.b32.xlu0 %v77_v12, %s1024_s15  ;;  %v50_v13 = vsel %vm47_vm0, %v48_v8, %v49_v3  ;;  %904 = vmatpush3.msk.msra.mxu0 %vm127_vm1, %v108_v10  ;;  %v86_v15 = vsel %vm57_vm2, %v84_v7, %v85_v9  ;;  %v339_v42 = vld [vmem:[%s1404_s3 + $0x48] sm:$0xff]  ;;  %v338_v43 = vld [vmem:[%s1404_s3 + $0x40] sm:$0xff]  ;;  %v336_v45 = vld [vmem:[%s1404_s3 + $0x30] sm:$0xff]  ;;  %vm244_vm7 = vcmask 1044480   ;;  %s1030_s23 = smov 48   ;;  %s1031_s24 = smov 64  }
   0x6   :  { %905 = vmatprep.subr.mxu0 %v107_v11  ;;  %v60_v20 = vsel %vm57_vm2, %v58_v17, %v59_v16  ;;  %920 = vmatpush3.msra.mxu1 %v339_v42  ;;  %v335_v46 = vld [vmem:[%s1404_s3 + $0x28] sm:$0xff]  ;;  %v838_v47 = vld [vmem:[%s1405_s2] ss:$0 sm:$0xff]  ;;  %v333_v50 = vld [vmem:[%s1404_s3 + $0x18] sm:$0xff]  ;;  %vm263_vm8 = vcmask 130048   ;;  %vm266_vm9 = vcmask 261120  }
   0x7   :  { %906 = vmatpush3.msra.mxu0 %v107_v11  ;;  %921 = vmatprep.subr.mxu1 %v1026_v41  ;;  %v334_v48 = vld [vmem:[%s1404_s3 + $0x20] sm:$0xff]  ;;  %v332_v55 = vld [vmem:[%s1404_s3 + $0x10] sm:$0xff]  ;;  %v331_v56 = vld [vmem:[%s1404_s3 + $0x8] sm:$0xff]  ;;  %vm269_vm10 = vcmask 392192   ;;  %vm272_vm11 = vcmask 523264   ;;  %vm340_vm12 = vcmask 654336  }
   0x8   :  { %51 = vrot.lane.b32.xlu1 %v50_v13, %s1024_s15  ;;  %907 = vmatprep.subr.mxu0 %v106_v14  ;;  %v330_v61 = vld [vmem:[%s1404_s3] sm:$0xff]  ;;  %s1029_s3 = smov 32   ;;  %vm328_vm13 = vcmask 1041408   ;;  %vm432_vm14 = vcmask 257024   ;;  %vm544_vm15 = vcmask 785408  }
   0x9   :  { %87 = vrot.lane.b32.xlu0 %v86_v15, %s1025_s19  ;;  %908 = vmatpush3.msra.mxu0 %v106_v14 }
   0xa   :  { %909 = vmatprep.subr.mxu0 %v105_v18  ;;  %922 = vmatpush3.msra.mxu1 %v338_v43 }
   0xb   :  { %910 = vmatpush3.msra.mxu0 %v105_v18  ;;  %923 = vmatprep.subr.mxu1 %v1026_v41 }
   0xc   :  { %63 = vrot.lane.b32.xlu1 %v59_v16, %s1025_s19  ;;  %911 = vmatprep.subr.mxu0 %v104_v19 }
   0xd   :  { %61 = vrot.lane.b32.xlu0 %v60_v20, %s1025_s19  ;;  %912 = vmatpush3.msra.mxu0 %v104_v19 }
   0xe   :  { %924 = vmatpush3.msra.mxu1 %v337_v44  ;;  %939 = vmatprep.mubr.msk.f32.mxu1 %vm1028_vm6, %v1026_v41 }
   0xf   :  { %925 = vmatprep.subr.mxu1 %v1026_v41 }
  0x10   :  { %89 = vrot.lane.b32.xlu1 %v85_v9, %s1025_s19  ;;  %926 = vmatpush3.msra.mxu1 %v336_v45 }
  0x11   :  { %80 = vrot.lane.b32.xlu0 %v76_v5, %s1024_s15  ;;  %927 = vmatprep.subr.mxu1 %v1026_v41 }
  0x12   :  { %928 = vmatpush3.msra.mxu1 %v335_v46 }
  0x13   :  { %929 = vmatprep.subr.mxu1 %v1026_v41 }
  0x14   :  { %930 = vmatpush3.msra.mxu1 %v334_v48 }
  0x15   :  { %931 = vmatprep.subr.mxu1 %v1026_v41 }
  0x16   :  { %932 = vmatpush3.msra.mxu1 %v333_v50 }
  0x17   :  { %933 = vmatprep.subr.mxu1 %v1026_v41 }
  0x18   :  { %934 = vmatpush3.msra.mxu1 %v332_v55 }
  0x19   :  { %935 = vmatprep.subr.mxu1 %v1026_v41 }
  0x1a   :  { %936 = vmatpush3.msra.mxu1 %v331_v56 }
  0x1b   :  { %937 = vmatprep.subr.mxu1 %v1026_v41 }
  0x1c   :  { %938 = vmatpush3.msra.mxu1 %v330_v61 }
  0x76   :  { %v54_v21 = vpop.permute.xlu1 %53 }
  0x77   :  { %v79_v22 = vpop.permute.xlu0 %78  ;;  %v69_v28 = vsel %vm67_vm3, %v42_v0, %v54_v21 }
  0x78   :  { %v93_v24 = vsel %vm67_vm3, %v43_v1, %v79_v22 }
  0x7a   :  { %v52_v23 = vpop.permute.xlu1 %51 }
  0x7b   :  { %v88_v25 = vpop.permute.xlu0 %87  ;;  %v68_v30 = vsel %vm67_vm3, %v41_v6, %v52_v23 }
  0x7c   :  { %v95_v26 = vsel %vm70_vm4, %v93_v24, %v88_v25 }
  0x7d   :  { %v99_v27 = vrot.slane %v95_v26, 2 }
  0x7e   :  { %v64_v29 = vpop.permute.xlu1 %63 }
  0x7f   :  { %v72_v31 = vsel %vm70_vm4, %v69_v28, %v64_v29  ;;  %v62_v32 = vpop.permute.xlu0 %61 }
  0x80   :  { %v71_v33 = vsel %vm70_vm4, %v68_v30, %v62_v32  ;;  %v103_v34 = vsel %vm57_vm2, %v72_v31, %v99_v27 }
  0x81   :  { %913 = vmatprep.mubr.msk.f32.mxu0 %vm116_vm5, %v71_v33 }
  0x82   :  { %914 = vmatmul.mubr.msk.f32.vlgmr.msra.gmra.mxu0 %vm116_vm5, %v103_v34  ;;  %v90_v35 = vpop.permute.xlu1 %89 }
  0x83   :  { %v81_v36 = vpop.permute.xlu0 %80 }
  0x84   :  { %v94_v37 = vsel %vm67_vm3, %v1106_v2, %v81_v36 }
  0x85   :  { %v96_v38 = vsel %vm70_vm4, %v94_v37, %v90_v35 }
  0x86   :  { %v100_v39 = vrot.slane %v96_v38, 2 }
  0x88   :  { %v101_v40 = vsel %vm57_vm2, %v99_v27, %v100_v39 }
  0x89   :  { %916 = vmatprep.mubr.msk.f32.mxu0 %vm116_vm5, %v101_v40 }
  0x8a   :  { %917 = vmatmul.mubr.msk.f32.gmra.mxu0 %vm116_vm5, %v100_v39 }
 0x142   :  { %v915_v49 = vpop.f32.mrf.mxu0 }
 0x143   :  { %v203_v51 = vadd.f32 %v915_v49, %v838_v47 }
 0x144   :  { %v197_v52 = vpop.f32.mrf.mxu0 }
 0x145   :  { %v217_v53 = vmul.f32 0.2, %v203_v51  ;;  %v198_v54 = vadd.f32 %v838_v47, %v197_v52 }
 0x147   :  { %v1183_v57 = vmax.f32 %v203_v51, %v217_v53  ;;  %v216_v58 = vmul.f32 0.2, %v198_v54 }
 0x149   :  { %v1186_v59 = vmax.f32 %v198_v54, %v216_v58  ;;  %v227_v60 = vrot.slane %v1183_v57, 1  ;;  %v236_v1 = vrot.slane %v1183_v57, 2  ;;  %v246_v9 = vrot.slane %v1183_v57, 3 }
 0x14a   :  { %v918_v62 = vpop.f32.mrf.mxu0  ;;  %v255_v15 = vrot.slane %v1183_v57, 4 }
 0x14b   :  { %231 = vrot.lane.b32.xlu1 %v227_v60, %s1027_s22  ;;  %v226_v63 = vrot.slane %v1186_v59, 1  ;;  %v235_v0 = vrot.slane %v1186_v59, 2  ;;  %v245_v6 = vrot.slane %v1186_v59, 3  ;;  %v213_v7 = vadd.f32 %v918_v62, %v838_v47 }
 0x14c   :  { %v207_v2 = vpop.f32.mrf.mxu0  ;;  %v254_v12 = vrot.slane %v1186_v59, 4 }
 0x14d   :  { %v208_v3 = vadd.f32 %v838_v47, %v207_v2  ;;  %v228_v4 = vsel %vm47_vm0, %v226_v63, %v227_v60  ;;  %v237_v5 = vsel %vm57_vm2, %v235_v0, %v236_v1  ;;  %v247_v11 = vsel %vm244_vm7, %v245_v6, %v246_v9  ;;  %v539_v6 = vld [vmem:[%s1406_s6 + $0x38] sm:$0xff] }
 0x14e   :  { %229 = vrot.lane.b32.xlu0 %v228_v4, %s1027_s22  ;;  %v219_v13 = vmul.f32 0.2, %v213_v7  ;;  %v256_v16 = vsel %vm127_vm1, %v254_v12, %v255_v15  ;;  %v542_v4 = vld [vmem:[%s1406_s6 + $0x50] sm:$0xff] }
 0x14f   :  { %v218_v8 = vmul.f32 0.2, %v208_v3  ;;  %238 = vrot.lane.b32.xlu1 %v237_v5, %s1029_s3  ;;  %v541_v5 = vld [vmem:[%s1406_s6 + $0x48] sm:$0xff] }
 0x150   :  { %v223_v17 = vmax.f32 %v213_v7, %v219_v13  ;;  %v538_v7 = vld [vmem:[%s1406_s6 + $0x30] sm:$0xff] }
 0x151   :  { %v222_v10 = vmax.f32 %v208_v3, %v218_v8 }
 0x152   :  { %248 = vrot.lane.b32.xlu0 %v247_v11, %s1030_s23  ;;  %v279_v21 = vrot.slane %v223_v17, 1  ;;  %v288_v24 = vrot.slane %v223_v17, 2  ;;  %v297_v25 = vrot.slane %v223_v17, 3  ;;  %v306_v28 = vrot.slane %v223_v17, 4 }
 0x153   :  { %v296_v14 = vrot.slane %v222_v10, 3  ;;  %v305_v18 = vrot.slane %v222_v10, 4  ;;  %v287_v19 = vrot.slane %v222_v10, 2  ;;  %v277_v20 = vrot.slane %v222_v10, 1 }
 0x155   :  { %299 = vrot.lane.b32.xlu1 %v296_v14, %s1030_s23  ;;  %v278_v22 = vsel %vm47_vm0, %v227_v60, %v277_v20  ;;  %v280_v23 = vsel %vm47_vm0, %v277_v20, %v279_v21  ;;  %v289_v26 = vsel %vm57_vm2, %v287_v19, %v288_v24  ;;  %v298_v27 = vsel %vm244_vm7, %v296_v14, %v297_v25 }
 0x156   :  { %257 = vrot.lane.b32.xlu0 %v256_v16, %s1031_s24  ;;  %v307_v29 = vsel %vm127_vm1, %v305_v18, %v306_v28 }
 0x159   :  { %308 = vrot.lane.b32.xlu1 %v305_v18, %s1031_s24 }
 0x15a   :  { %290 = vrot.lane.b32.xlu0 %v287_v19, %s1029_s3 }
 0x15d   :  { %281 = vrot.lane.b32.xlu1 %v278_v22, %s1027_s22 }
 0x15e   :  { %283 = vrot.lane.b32.xlu0 %v280_v23, %s1027_s22 }
 0x161   :  { %292 = vrot.lane.b32.xlu1 %v289_v26, %s1029_s3 }
 0x162   :  { %301 = vrot.lane.b32.xlu0 %v298_v27, %s1030_s23 }
 0x165   :  { %240 = vrot.lane.b32.xlu1 %v236_v1, %s1029_s3 }
 0x166   :  { %310 = vrot.lane.b32.xlu0 %v307_v29, %s1031_s24 }
 0x169   :  { %259 = vrot.lane.b32.xlu1 %v255_v15, %s1031_s24 }
 0x16a   :  { %250 = vrot.lane.b32.xlu0 %v246_v9, %s1030_s23 }
 0x1bd   :  { %v232_v30 = vpop.permute.xlu1 %231 }
 0x1c0   :  { %v230_v31 = vpop.permute.xlu0 %229 }
 0x1c1   :  { %v239_v32 = vpop.permute.xlu1 %238  ;;  %v264_v33 = vsel %vm263_vm8, %v1186_v59, %v230_v31  ;;  %v265_v59 = vsel %vm263_vm8, %v1183_v57, %v232_v30 }
 0x1c2   :  { %v267_v35 = vsel %vm266_vm9, %v264_v33, %v239_v32 }
 0x1c4   :  { %v249_v34 = vpop.permute.xlu0 %248 }
 0x1c5   :  { %v270_v37 = vsel %vm269_vm10, %v267_v35, %v249_v34 }
 0x1c7   :  { %v300_v36 = vpop.permute.xlu1 %299 }
 0x1c8   :  { %v258_v38 = vpop.permute.xlu0 %257 }
 0x1c9   :  { %v273_v39 = vsel %vm272_vm11, %v270_v37, %v258_v38 }
 0x1ca   :  { %940 = vmatmul.mubr.msk.f32.vlgmr.msra.gmra.mxu1 %vm340_vm12, %v273_v39 }
 0x1cb   :  { %v309_v40 = vpop.permute.xlu1 %308  ;;  %942 = vmatprep.mubr.msk.f32.mxu1 %vm1028_vm6, %v1026_v41 }
 0x1cc   :  { %v291_v42 = vpop.permute.xlu0 %290 }
 0x1cf   :  { %v282_v43 = vpop.permute.xlu1 %281 }
 0x1d0   :  { %v314_v44 = vsel %vm263_vm8, %v1183_v57, %v282_v43  ;;  %v284_v45 = vpop.permute.xlu0 %283  ;;  %v543_v57 = vld [vmem:[%s1406_s6 + $0x58] sm:$0xff] }
 0x1d1   :  { %v316_v46 = vsel %vm266_vm9, %v314_v44, %v291_v42  ;;  %v315_v48 = vsel %vm263_vm8, %v222_v10, %v284_v45  ;;  %948 = vmatprep.subr.mxu0 %v543_v57  ;;  %v467_v45 = vlaneseq }
 0x1d2   :  { %v318_v51 = vsel %vm269_vm10, %v316_v46, %v300_v36  ;;  %949 = vmatpush3.msra.mxu0 %v543_v57 }
 0x1d3   :  { %v293_v47 = vpop.permute.xlu1 %292  ;;  %v320_v55 = vsel %vm272_vm11, %v318_v51, %v309_v40  ;;  %950 = vmatprep.subr.mxu0 %v542_v4  ;;  %v468_v46 = vshrl.u32 %v467_v45, 7  ;;  %v463_v51 = vld [vmem:[%s1408_s5] sm:$0x1]  ;;  %v697_v45 = vld [vmem:[%s1409_s9 + $0x28] sm:$0xff] }
 0x1d4   :  { %v302_v49 = vpop.permute.xlu0 %301  ;;  %v317_v50 = vsel %vm266_vm9, %v315_v48, %v293_v47  ;;  %v324_v60 = vrot.slane %v320_v55, 4  ;;  %951 = vmatpush3.msra.mxu0 %v542_v4  ;;  %v459_v47 = vld [vmem:[%s1407_s4] sm:$0x1] }
 0x1d5   :  { %v319_v53 = vsel %vm269_vm10, %v317_v50, %v302_v49  ;;  %952 = vmatprep.subr.mxu0 %v541_v5  ;;  %v1279_v48 = vsub.s32 0, %v468_v46  ;;  %v696_v46 = vld [vmem:[%s1409_s9 + $0x20] sm:$0xff] }
 0x1d6   :  { %953 = vmatpush3.msra.mxu0 %v541_v5  ;;  %v533_v5 = vld [vmem:[%s1406_s6 + $0x8] sm:$0xff] }
 0x1d7   :  { %v241_v52 = vpop.permute.xlu1 %240 }
 0x1d8   :  { %v311_v54 = vpop.permute.xlu0 %310  ;;  %v268_v61 = vsel %vm266_vm9, %v265_v59, %v241_v52 }
 0x1d9   :  { %v321_v56 = vsel %vm272_vm11, %v319_v53, %v311_v54  ;;  %v537_v54 = vld [vmem:[%s1406_s6 + $0x28] sm:$0xff] }
 0x1da   :  { %v325_v58 = vrot.slane %v321_v56, 4  ;;  %v536_v56 = vld [vmem:[%s1406_s6 + $0x20] sm:$0xff] }
 0x1db   :  { %v260_v63 = vpop.permute.xlu1 %259 }
 0x1dc   :  { %v251_v62 = vpop.permute.xlu0 %250  ;;  %v326_v2 = vsel %vm127_vm1, %v324_v60, %v325_v58 }
 0x1dd   :  { %v271_v0 = vsel %vm269_vm10, %v268_v61, %v251_v62  ;;  %v535_v62 = vld [vmem:[%s1406_s6 + $0x18] sm:$0xff] }
 0x1de   :  { %v274_v1 = vsel %vm272_vm11, %v271_v0, %v260_v63 }
 0x1df   :  { %v329_v3 = vsel %vm328_vm13, %v274_v1, %v326_v2  ;;  %v534_v2 = vld [vmem:[%s1406_s6 + $0x10] sm:$0xff] }
 0x1e0   :  { %943 = vmatmul.mubr.msk.f32.gmra.mxu1 %vm340_vm12, %v329_v3 }
 0x1e1   :  { %945 = vmatprep.mubr.msk.f32.mxu1 %vm1028_vm6, %v1026_v41  ;;  %v540_v41 = vld [vmem:[%s1406_s6 + $0x40] sm:$0xff] }
 0x1e2   :  { %954 = vmatprep.subr.mxu0 %v540_v41 }
 0x1e3   :  { %955 = vmatpush3.msra.mxu0 %v540_v41 }
 0x1e4   :  { %946 = vmatmul.mubr.msk.f32.gmra.mxu1 %vm340_vm12, %v325_v58  ;;  %956 = vmatprep.subr.mxu0 %v539_v6 }
 0x1e5   :  { %957 = vmatpush3.msra.mxu0 %v539_v6 }
 0x1e6   :  { %958 = vmatprep.subr.mxu0 %v538_v7 }
 0x1e7   :  { %959 = vmatpush3.msra.mxu0 %v538_v7  ;;  %v532_v7 = vld [vmem:[%s1406_s6] sm:$0xff] }
 0x1e8   :  { %960 = vmatprep.subr.mxu0 %v537_v54 }
 0x1e9   :  { %961 = vmatpush3.msra.mxu0 %v537_v54 }
 0x1ea   :  { %962 = vmatprep.subr.mxu0 %v536_v56 }
 0x1eb   :  { %963 = vmatpush3.msra.mxu0 %v536_v56 }
 0x1ec   :  { %964 = vmatprep.subr.mxu0 %v535_v62 }
 0x1ed   :  { %965 = vmatpush3.msra.mxu0 %v535_v62 }
 0x1ee   :  { %966 = vmatprep.subr.mxu0 %v534_v2 }
 0x1ef   :  { %967 = vmatpush3.msra.mxu0 %v534_v2 }
 0x1f0   :  { %968 = vmatprep.subr.mxu0 %v533_v5 }
 0x1f1   :  { %969 = vmatpush3.msra.mxu0 %v533_v5 }
 0x1f2   :  { %970 = vmatprep.subr.mxu0 %v532_v7 }
 0x1f3   :  { %971 = vmatpush3.msra.mxu0 %v532_v7 }
 0x28a   :  { %v415_v8 = vpop.f32.mrf.mxu1 }
 0x28b   :  { %v441_v11 = vmul.f32 %v415_v8, %v415_v8  ;;  %v429_v15 = vsel %vm266_vm9, %v415_v8, 0.0 }
 0x28c   :  { %v941_v9 = vpop.f32.mrf.mxu1 }
 0x28d   :  { %v444_v19 = vsel %vm266_vm9, %v441_v11, 0.0 }
 0x2a0   :  { %v420_v10 = vpop.f32.mrf.mxu1 }
 0x2a1   :  { %v430_v12 = vsel %vm266_vm9, %v420_v10, 0.0  ;;  %v442_v13 = vmul.f32 %v420_v10, %v420_v10 }
 0x2a2   :  { %v944_v14 = vpop.f32.mrf.mxu1  ;;  %v431_v17 = vadd.f32 %v430_v12, %v429_v15 }
 0x2a3   :  { %v445_v16 = vsel %vm266_vm9, %v442_v13, 0.0 }
 0x2a4   :  { %v425_v18 = vpop.f32.mrf.mxu1  ;;  %v446_v22 = vadd.f32 %v445_v16, %v444_v19 }
 0x2a5   :  { %v433_v20 = vsel %vm432_vm14, %v425_v18, 0.0  ;;  %v443_v21 = vmul.f32 %v425_v18, %v425_v18 }
 0x2a6   :  { %v434_v23 = vadd.f32 %v433_v20, %v431_v17  ;;  %v947_v24 = vpop.f32.mrf.mxu1 }
 0x2a7   :  { %v447_v25 = vsel %vm432_vm14, %v443_v21, 0.0 }
 0x2a8   :  { %v435_v26 = vrot.slane %v434_v23, 4  ;;  %v448_v27 = vadd.f32 %v447_v25, %v446_v22 }
 0x2aa   :  { %v436_v28 = vadd.f32 %v435_v26, %v434_v23  ;;  %v449_v29 = vrot.slane %v448_v27, 4 }
 0x2ac   :  { %v437_v30 = vrot.slane %v436_v28, 2  ;;  %v450_v31 = vadd.f32 %v449_v29, %v448_v27 }
 0x2ae   :  { %v438_v32 = vadd.f32 %v437_v30, %v436_v28  ;;  %v451_v33 = vrot.slane %v450_v31, 2 }
 0x2b0   :  { %v439_v34 = vrot.slane %v438_v32, 1  ;;  %v452_v35 = vadd.f32 %v451_v33, %v450_v31 }
 0x2b2   :  { %v440_v36 = vadd.f32 %v439_v34, %v438_v32  ;;  %v453_v37 = vrot.slane %v452_v35, 1  ;;  %v707_v34 = vld [vmem:[%s1409_s9 + $0x78] sm:$0xff] }
 0x2b3   :  { %975 = vmatprep.subr.mxu1 %v707_v34 }
 0x2b4   :  { %v454_v38 = vadd.f32 %v453_v37, %v452_v35  ;;  %v455_v39 = vmul.f32 0.05, %v440_v36  ;;  %v706_v35 = vld [vmem:[%s1409_s9 + $0x70] sm:$0xff]  ;;  %976 = vmatpush3.msra.mxu1 %v707_v34  ;;  %v705_v36 = vld [vmem:[%s1409_s9 + $0x68] sm:$0xff]  ;;  %v704_v37 = vld [vmem:[%s1409_s9 + $0x60] sm:$0xff] }
 0x2b5   :  { %977 = vmatprep.subr.mxu1 %v706_v35 }
 0x2b6   :  { %v456_v40 = vmul.f32 0.05, %v454_v38  ;;  %v457_v42 = vmul.f32 %v455_v39, %v455_v39  ;;  %978 = vmatpush3.msra.mxu1 %v706_v35  ;;  %v703_v38 = vld [vmem:[%s1409_s9 + $0x58] sm:$0xff] }
 0x2b7   :  { %979 = vmatprep.subr.mxu1 %v705_v36 }
 0x2b8   :  { %v458_v43 = vsub.f32 %v456_v40, %v457_v42  ;;  %980 = vmatpush3.msra.mxu1 %v705_v36  ;;  %v701_v40 = vld [vmem:[%s1409_s9 + $0x48] sm:$0xff]  ;;  %v700_v42 = vld [vmem:[%s1409_s9 + $0x40] sm:$0xff] }
 0x2b9   :  { %981 = vmatprep.subr.mxu1 %v704_v37 }
 0x2ba   :  { %v460_v44 = vadd.f32 1e-05, %v458_v43  ;;  %982 = vmatpush3.msra.mxu1 %v704_v37  ;;  %v699_v43 = vld [vmem:[%s1409_s9 + $0x38] sm:$0xff] }
 0x2bb   :  { %983 = vmatprep.subr.mxu1 %v703_v38 }
 0x2bc   :  { %1018 = vrsqrt.f32 %v460_v44  ;;  %984 = vmatpush3.msra.mxu1 %v703_v38  ;;  %v698_v44 = vld [vmem:[%s1409_s9 + $0x30] sm:$0xff] }
 0x2c9   :  { %v1019_v49 = vpop.eup %1018 }
 0x2ca   :  { %v462_v50 = vmul.f32 %v1019_v49, %v459_v47  ;;  %v695_v47 = vld [vmem:[%s1409_s9 + $0x18] sm:$0xff]  ;;  %v694_v49 = vld [vmem:[%s1409_s9 + $0x10] sm:$0xff] }
 0x2cc   :  { %v464_v52 = vmul.f32 %v462_v50, %v455_v39  ;;  %v470_v53 = vrot.slane %v462_v50, %v1279_v48  ;;  %v702_v39 = vld [vmem:[%s1409_s9 + $0x50] sm:$0xff] }
 0x2cd   :  { %985 = vmatprep.subr.mxu1 %v702_v39 }
 0x2ce   :  { %v465_v55 = vsub.f32 %v463_v51, %v464_v52  ;;  %v472_v58 = vmul.f32 %v470_v53, %v415_v8  ;;  %v473_v59 = vmul.f32 %v470_v53, %v420_v10  ;;  %v474_v60 = vmul.f32 %v470_v53, %v425_v18  ;;  %986 = vmatpush3.msra.mxu1 %v702_v39 }
 0x2cf   :  { %987 = vmatprep.subr.mxu1 %v701_v40 }
 0x2d0   :  { %v479_v61 = vrot.slane %v465_v55, %v1279_v48  ;;  %988 = vmatpush3.msra.mxu1 %v701_v40 }
 0x2d1   :  { %989 = vmatprep.subr.mxu1 %v700_v42 }
 0x2d2   :  { %v483_v63 = vadd.f32 %v479_v61, %v474_v60  ;;  %v482_v0 = vadd.f32 %v479_v61, %v473_v59  ;;  %v481_v1 = vadd.f32 %v479_v61, %v472_v58  ;;  %990 = vmatpush3.msra.mxu1 %v700_v42 }
 0x2d3   :  { %991 = vmatprep.subr.mxu1 %v699_v43 }
 0x2d4   :  { %v486_v3 = vmul.f32 0.2, %v483_v63  ;;  %v485_v57 = vmul.f32 0.2, %v482_v0  ;;  %v484_v4 = vmul.f32 0.2, %v481_v1  ;;  %992 = vmatpush3.msra.mxu1 %v699_v43 }
 0x2d5   :  { %993 = vmatprep.subr.mxu1 %v698_v44 }
 0x2d6   :  { %v489_v41 = vmax.f32 %v483_v63, %v486_v3  ;;  %v488_v6 = vmax.f32 %v482_v0, %v485_v57  ;;  %v487_v10 = vmax.f32 %v481_v1, %v484_v4  ;;  %994 = vmatpush3.msra.mxu1 %v698_v44 }
 0x2d7   :  { %995 = vmatprep.subr.mxu1 %v697_v45 }
 0x2d8   :  { %v507_v8 = vrot.slane %v489_v41, 1  ;;  %v493_v9 = vrot.slane %v488_v6, 1  ;;  %v515_v12 = vrot.slane %v489_v41, 2  ;;  %v499_v13 = vrot.slane %v488_v6, 2  ;;  %996 = vmatpush3.msra.mxu1 %v697_v45 }
 0x2d9   :  { %v498_v14 = vrot.slane %v487_v10, 2  ;;  %v492_v16 = vrot.slane %v487_v10, 1  ;;  %997 = vmatprep.subr.mxu1 %v696_v46 }
 0x2da   :  { %511 = vrot.lane.b32.xlu1 %v507_v8, %s1029_s3  ;;  %v508_v11 = vsel %vm47_vm0, %v493_v9, %v507_v8  ;;  %v516_v15 = vsel %vm57_vm2, %v499_v13, %v515_v12  ;;  %998 = vmatpush3.msra.mxu1 %v696_v46 }
 0x2db   :  { %509 = vrot.lane.b32.xlu0 %v508_v11, %s1029_s3  ;;  %v500_v17 = vsel %vm57_vm2, %v498_v14, %v499_v13  ;;  %v494_v18 = vsel %vm47_vm0, %v492_v16, %v493_v9  ;;  %999 = vmatprep.subr.mxu1 %v695_v47 }
 0x2dc   :  { %1000 = vmatpush3.msra.mxu1 %v695_v47 }
 0x2dd   :  { %1001 = vmatprep.subr.mxu1 %v694_v49 }
 0x2de   :  { %519 = vrot.lane.b32.xlu1 %v515_v12, %s1031_s24  ;;  %1002 = vmatpush3.msra.mxu1 %v694_v49  ;;  %v649_v12 = vld [vmem:[%s1410_s7] sm:$0x1] }
 0x2df   :  { %517 = vrot.lane.b32.xlu0 %v516_v15, %s1031_s24  ;;  %v653_v15 = vld [vmem:[%s1411_s8] sm:$0x1] }
 0x2e2   :  { %501 = vrot.lane.b32.xlu1 %v500_v17, %s1031_s24 }
 0x2e3   :  { %495 = vrot.lane.b32.xlu0 %v494_v18, %s1029_s3 }
 0x34c   :  { %v512_v19 = vpop.permute.xlu1 %511 }
 0x34d   :  { %v510_v20 = vpop.permute.xlu0 %509  ;;  %v524_v21 = vsel %vm266_vm9, %v489_v41, %v512_v19  ;;  %v693_v19 = vld [vmem:[%s1409_s9 + $0x8] sm:$0xff] }
 0x34e   :  { %v523_v23 = vsel %vm266_vm9, %v488_v6, %v510_v20  ;;  %v692_v20 = vld [vmem:[%s1409_s9] sm:$0xff]  ;;  %1003 = vmatprep.subr.mxu1 %v693_v19 }
 0x34f   :  { %1004 = vmatpush3.msra.mxu1 %v693_v19 }
 0x350   :  { %v520_v22 = vpop.permute.xlu1 %519  ;;  %1005 = vmatprep.subr.mxu1 %v692_v20 }
 0x351   :  { %v526_v24 = vsel %vm272_vm11, %v524_v21, %v520_v22  ;;  %v518_v25 = vpop.permute.xlu0 %517  ;;  %1006 = vmatpush3.msra.mxu1 %v692_v20 }
 0x352   :  { %v525_v26 = vsel %vm272_vm11, %v523_v23, %v518_v25  ;;  %v530_v27 = vrot.slane %v526_v24, 2 }
 0x353   :  { %v529_v28 = vrot.slane %v525_v26, 2 }
 0x354   :  { %v502_v30 = vpop.permute.xlu1 %501 }
 0x355   :  { %v496_v29 = vpop.permute.xlu0 %495  ;;  %v531_v33 = vsel %vm57_vm2, %v529_v28, %v530_v27 }
 0x356   :  { %v504_v31 = vsel %vm266_vm9, %v487_v10, %v496_v29 }
 0x357   :  { %v505_v32 = vsel %vm272_vm11, %v504_v31, %v502_v30 }
 0x358   :  { %972 = vmatprep.mubr.msk.f32.mxu0 %vm544_vm15, %v505_v32 }
 0x359   :  { %973 = vmatmul.mubr.msk.f32.vlgmr.msra.gmra.mxu0 %vm544_vm15, %v531_v33 }
 0x419   :  { %v974_v50 = vpop.f32.mrf.mxu0 }
 0x41a   :  { %v635_v51 = vmul.f32 %v974_v50, %v974_v50  ;;  %v626_v53 = vsel %vm272_vm11, %v974_v50, 0.0 }
 0x41b   :  { %v616_v52 = vpop.f32.mrf.mxu0 }
 0x41c   :  { %v625_v54 = vsel %vm272_vm11, %v616_v52, 0.0  ;;  %v634_v55 = vmul.f32 %v616_v52, %v616_v52  ;;  %v637_v58 = vsel %vm272_vm11, %v635_v51, 0.0 }
 0x41d   :  { %v627_v56 = vadd.f32 %v626_v53, %v625_v54 }
 0x41e   :  { %v636_v59 = vsel %vm272_vm11, %v634_v55, 0.0 }
 0x41f   :  { %v628_v60 = vrot.slane %v627_v56, 4  ;;  %v638_v61 = vadd.f32 %v637_v58, %v636_v59 }
 0x421   :  { %v629_v62 = vadd.f32 %v628_v60, %v627_v56  ;;  %v639_v63 = vrot.slane %v638_v61, 4 }
 0x423   :  { %v630_v0 = vrot.slane %v629_v62, 2  ;;  %v640_v1 = vadd.f32 %v639_v63, %v638_v61 }
 0x425   :  { %v631_v2 = vadd.f32 %v630_v0, %v629_v62  ;;  %v641_v3 = vrot.slane %v640_v1, 2 }
 0x427   :  { %v632_v57 = vrot.slane %v631_v2, 1  ;;  %v642_v4 = vadd.f32 %v641_v3, %v640_v1 }
 0x429   :  { %v633_v5 = vadd.f32 %v632_v57, %v631_v2  ;;  %v643_v41 = vrot.slane %v642_v4, 1  ;;  %v805_v2 = vld [vmem:[%s1412_s10] sm:$0x1] }
 0x42b   :  { %v644_v6 = vadd.f32 %v643_v41, %v642_v4  ;;  %v645_v7 = vmul.f32 0.0625, %v633_v5  ;;  %v809_v4 = vld [vmem:[%s1413_s11] sm:$0x1] }
 0x42d   :  { %v646_v8 = vmul.f32 0.0625, %v644_v6  ;;  %v647_v9 = vmul.f32 %v645_v7, %v645_v7 }
 0x42f   :  { %v648_v10 = vsub.f32 %v646_v8, %v647_v9 }
 0x431   :  { %v650_v11 = vadd.f32 1e-05, %v648_v10 }
 0x433   :  { %1020 = vrsqrt.f32 %v650_v11 }
 0x440   :  { %v1021_v13 = vpop.eup %1020 }
 0x441   :  { %v652_v14 = vmul.f32 %v1021_v13, %v649_v12 }
 0x443   :  { %v654_v16 = vmul.f32 %v652_v14, %v645_v7  ;;  %v660_v17 = vrot.slane %v652_v14, %v1279_v48 }
 0x445   :  { %v655_v18 = vsub.f32 %v653_v15, %v654_v16  ;;  %v662_v21 = vmul.f32 %v660_v17, %v616_v52  ;;  %v663_v22 = vmul.f32 %v974_v50, %v660_v17 }
 0x447   :  { %v668_v23 = vrot.slane %v655_v18, %v1279_v48 }
 0x449   :  { %v670_v24 = vadd.f32 %v668_v23, %v662_v21  ;;  %v671_v25 = vadd.f32 %v668_v23, %v663_v22 }
 0x44b   :  { %v672_v26 = vmul.f32 0.2, %v670_v24  ;;  %v673_v27 = vmul.f32 0.2, %v671_v25 }
 0x44d   :  { %v674_v28 = vmax.f32 %v670_v24, %v672_v26  ;;  %v675_v29 = vmax.f32 %v671_v25, %v673_v27 }
 0x44f   :  { %v683_v30 = vrot.slane %v675_v29, 1  ;;  %v677_v31 = vrot.slane %v674_v28, 1 }
 0x451   :  { %684 = vrot.lane.b32.xlu0 %v683_v30, %s1031_s24  ;;  %678 = vrot.lane.b32.xlu1 %v677_v31, %s1031_s24 }
 0x4c3   :  { %v685_v32 = vpop.permute.xlu0 %684  ;;  %v679_v33 = vpop.permute.xlu1 %678 }
 0x4c4   :  { %v687_v34 = vsel %vm272_vm11, %v675_v29, %v685_v32  ;;  %v681_v36 = vsel %vm272_vm11, %v674_v28, %v679_v33 }
 0x4c5   :  { %v689_v35 = vrot.slane %v687_v34, 1 }
 0x4c7   :  { %v691_v37 = vsel %vm47_vm0, %v681_v36, %v689_v35 }
 0x4c8   :  { %1007 = vmatprep.mubr.f32.mxu1 %v691_v37 }
 0x4c9   :  { %1008 = vmatmul.mubr.f32.vlgmr.msra.gmra.mxu1 %v689_v35 }
 0x589   :  { %v1009_v38 = vpop.f32.mrf.mxu1 }
 0x58a   :  { %v792_v39 = vmul.f32 %v1009_v38, %v1009_v38  ;;  %v783_v40 = vsel %vm57_vm2, %v1009_v38, 0.0 }
 0x58b   :  { %v774_v42 = vpop.f32.mrf.mxu1 }
 0x58c   :  { %v784_v43 = vadd.f32 %v783_v40, %v774_v42  ;;  %v791_v44 = vmul.f32 %v774_v42, %v774_v42  ;;  %v793_v45 = vsel %vm57_vm2, %v792_v39, 0.0 }
 0x58e   :  { %v785_v46 = vrot.slane %v784_v43, 4  ;;  %v794_v47 = vadd.f32 %v793_v45, %v791_v44 }
 0x590   :  { %v786_v49 = vadd.f32 %v785_v46, %v784_v43  ;;  %v795_v50 = vrot.slane %v794_v47, 4 }
 0x592   :  { %v787_v51 = vrot.slane %v786_v49, 2  ;;  %v796_v52 = vadd.f32 %v795_v50, %v794_v47 }
 0x594   :  { %v788_v53 = vadd.f32 %v787_v51, %v786_v49  ;;  %v797_v54 = vrot.slane %v796_v52, 2 }
 0x596   :  { %v789_v55 = vrot.slane %v788_v53, 1  ;;  %v798_v56 = vadd.f32 %v797_v54, %v796_v52 }
 0x598   :  { %v790_v58 = vadd.f32 %v789_v55, %v788_v53  ;;  %v799_v59 = vrot.slane %v798_v56, 1 }
 0x59a   :  { %v800_v60 = vadd.f32 %v799_v59, %v798_v56  ;;  %v801_v61 = vmul.f32 0.071428575, %v790_v58 }
 0x59c   :  { %v802_v62 = vmul.f32 0.071428575, %v800_v60  ;;  %v803_v63 = vmul.f32 %v801_v61, %v801_v61 }
 0x59e   :  { %v804_v0 = vsub.f32 %v802_v62, %v803_v63 }
 0x5a0   :  { %v806_v1 = vadd.f32 1e-05, %v804_v0 }
 0x5a2   :  { %1022 = vrsqrt.f32 %v806_v1 }
 0x5af   :  { %v1023_v3 = vpop.eup %1022 }
 0x5b0   :  { %v808_v57 = vmul.f32 %v1023_v3, %v805_v2 }
 0x5b2   :  { %v810_v5 = vmul.f32 %v808_v57, %v801_v61  ;;  %v816_v41 = vrot.slane %v808_v57, %v1279_v48 }
 0x5b4   :  { %v811_v6 = vsub.f32 %v809_v4, %v810_v5  ;;  %v818_v7 = vmul.f32 %v816_v41, %v774_v42  ;;  %v819_v8 = vmul.f32 %v1009_v38, %v816_v41 }
 0x5b6   :  { %v824_v9 = vrot.slane %v811_v6, %v1279_v48 }
 0x5b8   :  { %v826_v10 = vadd.f32 %v824_v9, %v818_v7  ;;  %v827_v11 = vadd.f32 %v824_v9, %v819_v8 }
 0x5ba   :  { %v828_v12 = vmul.f32 0.2, %v826_v10  ;;  %v829_v13 = vmul.f32 0.2, %v827_v11 }
 0x5bc   :  { %v830_v14 = vmax.f32 %v826_v10, %v828_v12  ;;  %v831_v15 = vmax.f32 %v827_v11, %v829_v13 }
 0x5be   :  { %832 = vst [vmem:[%s1414_s12] sm:$0xff] %v830_v14  ;;  %833 = vst [vmem:[%s1414_s12 + $0x8] sm:$0x3f] %v831_v15 }

</bundles_post_ra>
